<compile_context>
chip_gen: v7x
topology: tpu7x:2x2x1
jax: 0.10.0
libtpu: 0.0.40
codegen_flags: <defaults>
</compile_context>

<pallas_src>
import functools
import math

import jax
import jax.numpy as jnp
from jax.experimental import pallas as pl
from jax.experimental.pallas import tpu as pltpu


# Portable scoped-VMEM cap: well under v7x's 64 MiB physical VMEM and raises
# the v5e 16 MiB default; tiles below fit with double-buffering.
_VMEM_LIMIT_BYTES = 32 * 1024 * 1024


def _pick_tile(dim, preferred, align):
    """Largest tile <= `preferred` that is a multiple of `align` and divides
    `dim`; falls back to the full dimension (always a legal block shape)."""
    if dim <= preferred:
        return dim
    t = (preferred // align) * align
    while t >= align:
        if dim % t == 0:
            return t
        t -= align
    return dim


# ----------------------------------------------------------------------------
# Tiled linear kernel:  y = x @ W + b   (used for the K / V projections)
# ----------------------------------------------------------------------------
def _linear_kernel(x_ref, w_ref, b_ref, o_ref, *, compute_dtype):
    x = x_ref[...].astype(compute_dtype)          # (tm, Din)
    w = w_ref[...].astype(compute_dtype)          # (Din, tn)
    y = jnp.dot(x, w, preferred_element_type=jnp.float32) + b_ref[...]
    o_ref[...] = y.astype(o_ref.dtype)


def pallas_linear(x, w, b, *, out_dtype=None, compute_dtype=jnp.bfloat16,
                  block_m=256, block_n=512):
    """x: (M, Din), w: (Din, Dout), b: (Dout,) -> (M, Dout)."""
    M, Din = x.shape
    Dout = w.shape[1]
    out_dtype = out_dtype if out_dtype is not None else x.dtype

    sub = 16 if jnp.dtype(out_dtype).itemsize < 4 else 8
    tm = _pick_tile(M, block_m, sub)
    tn = _pick_tile(Dout, block_n, 128)
    grid = (M // tm, Dout // tn)

    # Cast the weight once on the host side so each tile streams half the bytes.
    w_c = w.astype(compute_dtype)
    b2 = b.reshape(1, Dout).astype(jnp.float32)
    kernel = functools.partial(_linear_kernel, compute_dtype=compute_dtype)

    return pl.pallas_call(
        kernel,
        out_shape=jax.ShapeDtypeStruct((M, Dout), out_dtype),
        grid=grid,
        in_specs=[
            pl.BlockSpec((tm, Din), lambda i, j: (i, 0)),
            pl.BlockSpec((Din, tn), lambda i, j: (0, j)),
            pl.BlockSpec((1, tn), lambda i, j: (0, j)),
        ],
        out_specs=pl.BlockSpec((tm, tn), lambda i, j: (i, j)),
        compiler_params=pltpu.CompilerParams(
            dimension_semantics=("parallel", "parallel"),
            vmem_limit_bytes=_VMEM_LIMIT_BYTES),
    )(x, w_c, b2)


# ----------------------------------------------------------------------------
# Fused kernel: Q-projection + per-head softmax attention + output projection.
# One grid step processes a (tm, .) tile of M = B*L rows for ALL heads and
# writes a lane-dense (tm, d_llm) output slab.
# ----------------------------------------------------------------------------
def _fused_reprog_kernel(x_ref, wq_ref, bq_ref, k_ref, v_ref, wo_ref, bo_ref,
                         o_ref, *, n_heads, d_head, compute_dtype):
    cd = compute_dtype

    # Q projection (1/sqrt(E) scale already folded into wq/bq in the wrapper).
    q = jnp.dot(x_ref[...].astype(cd), wq_ref[...],
                preferred_element_type=jnp.float32) + bq_ref[...]
    q = q.astype(cd)                              # (tm, H*E)

    k = k_ref[...]                                # (S, H*E), already compute dtype
    v = v_ref[...]                                # (S, H*E)

    head_outs = []
    for h in range(n_heads):                      # static loop, H is small
        sl = slice(h * d_head, (h + 1) * d_head)
        # scores = Q_h K_h^T (contract last axes -> no explicit transpose of K)
        s = jax.lax.dot_general(q[:, sl], k[:, sl], (((1,), (1,)), ((), ())),
                                preferred_element_type=jnp.float32)   # (tm, S)
        m = jnp.max(s, axis=-1, keepdims=True)
        p = jnp.exp(s - m)
        denom = jnp.sum(p, axis=-1, keepdims=True)
        a = p * pl.reciprocal(denom, approx=True)                     # softmax (f32)
        # TODO(synk): nn.Dropout(attention_dropout) is identity in eval mode.
        head_outs.append(jnp.dot(a.astype(cd), v[:, sl],
                                 preferred_element_type=jnp.float32))  # (tm, E)

    attn = jnp.concatenate(head_outs, axis=-1).astype(cd)             # (tm, H*E)

    # Output projection -> single lane-dense (tm, d_llm) store.
    y = jnp.dot(attn, wo_ref[...],
                preferred_element_type=jnp.float32) + bo_ref[...]
    o_ref[...] = y.astype(o_ref.dtype)


def fused_reprogramming(target2d, k, v, wq, bq, wo, bo, *, n_heads, d_head,
                        out_dtype, compute_dtype=jnp.bfloat16, block_m=256):
    """target2d: (M, d_model); k, v: (S, H*E); returns (M, d_llm)."""
    M, d_model = target2d.shape
    S, HE = k.shape
    d_llm = wo.shape[1]

    tm = _pick_tile(M, block_m, 8)
    grid = (M // tm,)

    # Resident operands: weights in bf16 (half the HBM traffic / VMEM bytes),
    # biases kept in f32 for the accumulation path.
    wq_c = wq.astype(compute_dtype)
    wo_c = wo.astype(compute_dtype)
    bq2 = bq.reshape(1, HE).astype(jnp.float32)
    bo2 = bo.reshape(1, d_llm).astype(jnp.float32)

    kernel = functools.partial(_fused_reprog_kernel, n_heads=n_heads,
                               d_head=d_head, compute_dtype=compute_dtype)

    return pl.pallas_call(
        kernel,
        out_shape=jax.ShapeDtypeStruct((M, d_llm), out_dtype),
        grid=grid,
        in_specs=[
            pl.BlockSpec((tm, d_model), lambda i: (i, 0)),   # target tile
            pl.BlockSpec((d_model, HE), lambda i: (0, 0)),   # wq   (resident)
            pl.BlockSpec((1, HE), lambda i: (0, 0)),         # bq   (resident)
            pl.BlockSpec((S, HE), lambda i: (0, 0)),         # K    (resident)
            pl.BlockSpec((S, HE), lambda i: (0, 0)),         # V    (resident)
            pl.BlockSpec((HE, d_llm), lambda i: (0, 0)),     # wo   (resident)
            pl.BlockSpec((1, d_llm), lambda i: (0, 0)),      # bo   (resident)
        ],
        out_specs=pl.BlockSpec((tm, d_llm), lambda i: (i, 0)),
        compiler_params=pltpu.CompilerParams(
            dimension_semantics=("parallel",),
            vmem_limit_bytes=_VMEM_LIMIT_BYTES),
    )(target2d, wq_c, bq2, k, v, wo_c, bo2)


# ----------------------------------------------------------------------------
# Full forward pass
# ----------------------------------------------------------------------------
def reprogramming_layer_forward(params, target, source, value, n_heads,
                                compute_dtype=jnp.bfloat16):
    B, L, d_model = target.shape
    S, d_llm = source.shape
    HE = params["wq"].shape[1]
    d_head = HE // n_heads
    scale = 1.0 / math.sqrt(d_head)

    # K / V projections over the (batch-independent) prototype tables; emit in
    # the compute dtype so the attention kernel streams half the bytes.
    k = pallas_linear(source, params["wk"], params["bk"],
                      out_dtype=compute_dtype, compute_dtype=compute_dtype)
    v = pallas_linear(value, params["wv"], params["bv"],
                      out_dtype=compute_dtype, compute_dtype=compute_dtype)

    # Fold the softmax 1/sqrt(E) scale into the query projection (free, f32).
    wq = params["wq"] * scale
    bq = params["bq"] * scale

    x2d = target.reshape(B * L, d_model)          # batch collapsed into MXU M dim
    y = fused_reprogramming(x2d, k, v, wq, bq, params["wo"], params["bo"],
                            n_heads=n_heads, d_head=d_head,
                            out_dtype=target.dtype, compute_dtype=compute_dtype)
    return y.reshape(B, L, d_llm)


# ----------------------------------------------------------------------------
# Pure-JAX f32 reference (mirrors the PyTorch forward) for correctness check
# ----------------------------------------------------------------------------
def reference_forward(params, target, source, value, n_heads):
    B, L, _ = target.shape
    S, _ = source.shape
    H = n_heads
    q = (target @ params["wq"] + params["bq"]).reshape(B, L, H, -1)
    k = (source @ params["wk"] + params["bk"]).reshape(S, H, -1)
    v = (value @ params["wv"] + params["bv"]).reshape(S, H, -1)
    E = q.shape[-1]
    scale = 1.0 / math.sqrt(E)
    scores = jnp.einsum("blhe,she->bhls", q, k)
    A = jax.nn.softmax(scale * scores, axis=-1)
    out = jnp.einsum("bhls,she->blhe", A, v).reshape(B, L, -1)
    return (out @ params["wo"] + params["bo"]).reshape(B, L, -1)


# ----------------------------------------------------------------------------
# Deterministic parameter init (shapes match nn.Linear; weights stored (in,out))
# ----------------------------------------------------------------------------
def init_params(key, d_model, n_heads, d_llm, d_keys=None, dtype=jnp.float32):
    d_keys = d_keys or d_model // n_heads
    dk = d_keys * n_heads
    keys = jax.random.split(key, 8)

    def lin(kw, kb, fan_in, fan_out):
        lim = 1.0 / math.sqrt(fan_in)
        w = jax.random.uniform(kw, (fan_in, fan_out), dtype, -lim, lim)
        b = jax.random.uniform(kb, (fan_out,), dtype, -lim, lim)
        return w, b

    wq, bq = lin(keys[0], keys[1], d_model, dk)
    wk, bk = lin(keys[2], keys[3], d_llm, dk)
    wv, bv = lin(keys[4], keys[5], d_llm, dk)
    wo, bo = lin(keys[6], keys[7], dk, d_llm)
    return dict(wq=wq, bq=bq, wk=wk, bk=bk, wv=wv, bv=bv, wo=wo, bo=bo)


if __name__ == "__main__":
    # Small shapes consistent with the module's forward signature.
    B, L, S = 2, 8, 16
    d_model, n_heads, d_llm = 32, 4, 64   # d_keys = d_model // n_heads = 8

    root = jax.random.PRNGKey(0)
    k_params, k_t, k_s, k_v = jax.random.split(root, 4)

    params = init_params(k_params, d_model, n_heads, d_llm)
    target = jax.random.normal(k_t, (B, L, d_model), jnp.float32)
    source = jax.random.normal(k_s, (S, d_llm), jnp.float32)
    value = jax.random.normal(k_v, (S, d_llm), jnp.float32)

    fwd = jax.jit(functools.partial(reprogramming_layer_forward, n_heads=n_heads))
    out = jax.block_until_ready(fwd(params, target, source, value))

    ref = reference_forward(params, target, source, value, n_heads)
    assert out.shape == (B, L, d_llm), out.shape
    max_err = float(jnp.max(jnp.abs(out - ref)))
    # bf16 MXU operands + approx reciprocal -> relaxed tolerance vs f32 reference.
    assert jnp.allclose(out, ref, atol=3e-2, rtol=3e-2), max_err

    print("KERNEL_OK")
</pallas_src>

<mosaic_0001>
module attributes {stable_mosaic.version = 11 : i64} {
  func.func @_linear_kernel(%arg0: i32, %arg1: i32, %arg2: memref<16x64xf32, #tpu.memory_space<vmem>>, %arg3: memref<64x32xbf16, #tpu.memory_space<vmem>>, %arg4: memref<1x32xf32, #tpu.memory_space<vmem>>, %arg5: memref<16x32xbf16, #tpu.memory_space<vmem>>) attributes {dimension_semantics = [#tpu.dimension_semantics<parallel>, #tpu.dimension_semantics<parallel>], iteration_bounds = array<i64: 1, 1>, scalar_prefetch = 0 : i64, scratch_operands = 0 : i64, tpu.core_type = #tpu.core_type<tc>, window_params = [{transform_indices = @transform_0, window_bounds = array<i64: 16, 64>}, {transform_indices = @transform_1, window_bounds = array<i64: 64, 32>}, {transform_indices = @transform_2, window_bounds = array<i64: 1, 32>}, {transform_indices = @transform_3, window_bounds = array<i64: 16, 32>}]} {
    %c0 = arith.constant 0 : index
    %c0_0 = arith.constant 0 : index
    %0 = vector.load %arg2[%c0, %c0_0] : memref<16x64xf32, #tpu.memory_space<vmem>>, vector<16x64xf32>
    %1 = arith.truncf %0 : vector<16x64xf32> to vector<16x64xbf16>
    %c0_1 = arith.constant 0 : index
    %c0_2 = arith.constant 0 : index
    %2 = vector.load %arg3[%c0_1, %c0_2] : memref<64x32xbf16, #tpu.memory_space<vmem>>, vector<64x32xbf16>
    %cst = arith.constant dense<0.000000e+00> : vector<16x32xf32>
    %3 = tpu.matmul %1, %2, %cst {dimension_numbers = #tpu.dot_dimension_numbers<[1], [0], [0], [1], [0, 0, 1, 1], [], []>} : vector<16x64xbf16>, vector<64x32xbf16>, vector<16x32xf32> -> vector<16x32xf32>
    %c0_3 = arith.constant 0 : index
    %c0_4 = arith.constant 0 : index
    %4 = vector.load %arg4[%c0_3, %c0_4] : memref<1x32xf32, #tpu.memory_space<vmem>>, vector<1x32xf32>
    %5 = vector.broadcast %4 : vector<1x32xf32> to vector<16x32xf32>
    %6 = arith.addf %3, %5 : vector<16x32xf32>
    %7 = arith.truncf %6 : vector<16x32xf32> to vector<16x32xbf16>
    %c0_5 = arith.constant 0 : index
    %c0_6 = arith.constant 0 : index
    %8 = vector.load %arg5[%c0_5, %c0_6] : memref<16x32xbf16, #tpu.memory_space<vmem>>, vector<16x32xbf16>
    tpu.vector_store %arg5[%c0_5, %c0_6], %7 {strides = array<i32>} : memref<16x32xbf16, #tpu.memory_space<vmem>>, vector<16x32xbf16>,
    return
  }
  func.func @transform_0(%arg0: i32, %arg1: i32) -> (i32, i32) {
    %c0_i32 = arith.constant 0 : i32
    %c0_i32_0 = arith.constant 0 : i32
    return %arg0, %c0_i32 : i32, i32
  }
  func.func @transform_1(%arg0: i32, %arg1: i32) -> (i32, i32) {
    %c0_i32 = arith.constant 0 : i32
    %c0_i32_0 = arith.constant 0 : i32
    return %c0_i32, %arg1 : i32, i32
  }
  func.func @transform_2(%arg0: i32, %arg1: i32) -> (i32, i32) {
    %c0_i32 = arith.constant 0 : i32
    %c0_i32_0 = arith.constant 0 : i32
    return %c0_i32, %arg1 : i32, i32
  }
  func.func @transform_3(%arg0: i32, %arg1: i32) -> (i32, i32) {
    %c0_i32 = arith.constant 0 : i32
    return %arg0, %arg1 : i32, i32
  }
}

module attributes {stable_mosaic.version = 11 : i64} {
  func.func @_fused_reprog_kernel(%arg0: i32, %arg1: memref<16x32xf32, #tpu.memory_space<vmem>>, %arg2: memref<32x32xbf16, #tpu.memory_space<vmem>>, %arg3: memref<1x32xf32, #tpu.memory_space<vmem>>, %arg4: memref<16x32xbf16, #tpu.memory_space<vmem>>, %arg5: memref<16x32xbf16, #tpu.memory_space<vmem>>, %arg6: memref<32x64xbf16, #tpu.memory_space<vmem>>, %arg7: memref<1x64xf32, #tpu.memory_space<vmem>>, %arg8: memref<16x64xf32, #tpu.memory_space<vmem>>) attributes {dimension_semantics = [#tpu.dimension_semantics<parallel>], iteration_bounds = array<i64: 1>, scalar_prefetch = 0 : i64, scratch_operands = 0 : i64, tpu.core_type = #tpu.core_type<tc>, window_params = [{transform_indices = @transform_0, window_bounds = array<i64: 16, 32>}, {pipeline_mode = #tpu.pipeline_mode<synchronous>, transform_indices = @transform_1, window_bounds = array<i64: 32, 32>}, {pipeline_mode = #tpu.pipeline_mode<synchronous>, transform_indices = @transform_2, window_bounds = array<i64: 1, 32>}, {pipeline_mode = #tpu.pipeline_mode<synchronous>, transform_indices = @transform_3, window_bounds = array<i64: 16, 32>}, {pipeline_mode = #tpu.pipeline_mode<synchronous>, transform_indices = @transform_4, window_bounds = array<i64: 16, 32>}, {pipeline_mode = #tpu.pipeline_mode<synchronous>, transform_indices = @transform_5, window_bounds = array<i64: 32, 64>}, {pipeline_mode = #tpu.pipeline_mode<synchronous>, transform_indices = @transform_6, window_bounds = array<i64: 1, 64>}, {transform_indices = @transform_7, window_bounds = array<i64: 16, 64>}]} {
    %c0 = arith.constant 0 : index
    %c0_0 = arith.constant 0 : index
    %0 = vector.load %arg1[%c0, %c0_0] : memref<16x32xf32, #tpu.memory_space<vmem>>, vector<16x32xf32>
    %1 = arith.truncf %0 : vector<16x32xf32> to vector<16x32xbf16>
    %c0_1 = arith.constant 0 : index
    %c0_2 = arith.constant 0 : index
    %2 = vector.load %arg2[%c0_1, %c0_2] : memref<32x32xbf16, #tpu.memory_space<vmem>>, vector<32x32xbf16>
    %cst = arith.constant dense<0.000000e+00> : vector<16x32xf32>
    %3 = tpu.matmul %1, %2, %cst {dimension_numbers = #tpu.dot_dimension_numbers<[1], [0], [0], [1], [0, 0, 1, 1], [], []>} : vector<16x32xbf16>, vector<32x32xbf16>, vector<16x32xf32> -> vector<16x32xf32>
    %c0_3 = arith.constant 0 : index
    %c0_4 = arith.constant 0 : index
    %4 = vector.load %arg3[%c0_3, %c0_4] : memref<1x32xf32, #tpu.memory_space<vmem>>, vector<1x32xf32>
    %5 = vector.broadcast %4 : vector<1x32xf32> to vector<16x32xf32>
    %6 = arith.addf %3, %5 : vector<16x32xf32>
    %7 = arith.truncf %6 : vector<16x32xf32> to vector<16x32xbf16>
    %c0_5 = arith.constant 0 : index
    %c0_6 = arith.constant 0 : index
    %8 = vector.load %arg4[%c0_5, %c0_6] : memref<16x32xbf16, #tpu.memory_space<vmem>>, vector<16x32xbf16>
    %c0_7 = arith.constant 0 : index
    %c0_8 = arith.constant 0 : index
    %9 = vector.load %arg5[%c0_7, %c0_8] : memref<16x32xbf16, #tpu.memory_space<vmem>>, vector<16x32xbf16>
    %10 = vector.extract_strided_slice %7 {offsets = [0, 0], sizes = [16, 8], strides = [1, 1]} : vector<16x32xbf16> to vector<16x8xbf16>
    %11 = vector.extract_strided_slice %8 {offsets = [0, 0], sizes = [16, 8], strides = [1, 1]} : vector<16x32xbf16> to vector<16x8xbf16>
    %cst_9 = arith.constant dense<0.000000e+00> : vector<16x16xf32>
    %12 = tpu.matmul %10, %11, %cst_9 {dimension_numbers = #tpu.dot_dimension_numbers<[1], [1], [0], [0], [0, 0, 1, 0], [], []>} : vector<16x8xbf16>, vector<16x8xbf16>, vector<16x16xf32> -> vector<16x16xf32>
    %cst_10 = arith.constant dense<0xFF800000> : vector<16xf32>
    %13 = vector.multi_reduction <maximumf>, %12, %cst_10 [1] : vector<16x16xf32> to vector<16xf32>
    %14 = vector.shape_cast %13 : vector<16xf32> to vector<16x1xf32>
    %15 = vector.broadcast %14 : vector<16x1xf32> to vector<16x16xf32>
    %16 = arith.subf %12, %15 : vector<16x16xf32>
    %17 = math.exp %16 : vector<16x16xf32>
    %cst_11 = arith.constant dense<0.000000e+00> : vector<16xf32>
    %18 = vector.multi_reduction <add>, %17, %cst_11 [1] : vector<16x16xf32> to vector<16xf32>
    %19 = vector.shape_cast %18 : vector<16xf32> to vector<16x1xf32>
    %20 = tpu.reciprocal %19 {approx = true} : vector<16x1xf32> -> vector<16x1xf32>
    %21 = vector.broadcast %20 : vector<16x1xf32> to vector<16x16xf32>
    %22 = arith.mulf %17, %21 : vector<16x16xf32>
    %23 = arith.truncf %22 : vector<16x16xf32> to vector<16x16xbf16>
    %24 = vector.extract_strided_slice %9 {offsets = [0, 0], sizes = [16, 8], strides = [1, 1]} : vector<16x32xbf16> to vector<16x8xbf16>
    %cst_12 = arith.constant dense<0.000000e+00> : vector<16x8xf32>
    %25 = tpu.matmul %23, %24, %cst_12 {dimension_numbers = #tpu.dot_dimension_numbers<[1], [0], [0], [1], [0, 0, 1, 1], [], []>} : vector<16x16xbf16>, vector<16x8xbf16>, vector<16x8xf32> -> vector<16x8xf32>
    %26 = vector.extract_strided_slice %7 {offsets = [0, 8], sizes = [16, 8], strides = [1, 1]} : vector<16x32xbf16> to vector<16x8xbf16>
    %27 = vector.extract_strided_slice %8 {offsets = [0, 8], sizes = [16, 8], strides = [1, 1]} : vector<16x32xbf16> to vector<16x8xbf16>
    %cst_13 = arith.constant dense<0.000000e+00> : vector<16x16xf32>
    %28 = tpu.matmul %26, %27, %cst_13 {dimension_numbers = #tpu.dot_dimension_numbers<[1], [1], [0], [0], [0, 0, 1, 0], [], []>} : vector<16x8xbf16>, vector<16x8xbf16>, vector<16x16xf32> -> vector<16x16xf32>
    %cst_14 = arith.constant dense<0xFF800000> : vector<16xf32>
    %29 = vector.multi_reduction <maximumf>, %28, %cst_14 [1] : vector<16x16xf32> to vector<16xf32>
    %30 = vector.shape_cast %29 : vector<16xf32> to vector<16x1xf32>
    %31 = vector.broadcast %30 : vector<16x1xf32> to vector<16x16xf32>
    %32 = arith.subf %28, %31 : vector<16x16xf32>
    %33 = math.exp %32 : vector<16x16xf32>
    %cst_15 = arith.constant dense<0.000000e+00> : vector<16xf32>
    %34 = vector.multi_reduction <add>, %33, %cst_15 [1] : vector<16x16xf32> to vector<16xf32>
    %35 = vector.shape_cast %34 : vector<16xf32> to vector<16x1xf32>
    %36 = tpu.reciprocal %35 {approx = true} : vector<16x1xf32> -> vector<16x1xf32>
    %37 = vector.broadcast %36 : vector<16x1xf32> to vector<16x16xf32>
    %38 = arith.mulf %33, %37 : vector<16x16xf32>
    %39 = arith.truncf %38 : vector<16x16xf32> to vector<16x16xbf16>
    %40 = vector.extract_strided_slice %9 {offsets = [0, 8], sizes = [16, 8], strides = [1, 1]} : vector<16x32xbf16> to vector<16x8xbf16>
    %cst_16 = arith.constant dense<0.000000e+00> : vector<16x8xf32>
    %41 = tpu.matmul %39, %40, %cst_16 {dimension_numbers = #tpu.dot_dimension_numbers<[1], [0], [0], [1], [0, 0, 1, 1], [], []>} : vector<16x16xbf16>, vector<16x8xbf16>, vector<16x8xf32> -> vector<16x8xf32>
    %42 = vector.extract_strided_slice %7 {offsets = [0, 16], sizes = [16, 8], strides = [1, 1]} : vector<16x32xbf16> to vector<16x8xbf16>
    %43 = vector.extract_strided_slice %8 {offsets = [0, 16], sizes = [16, 8], strides = [1, 1]} : vector<16x32xbf16> to vector<16x8xbf16>
    %cst_17 = arith.constant dense<0.000000e+00> : vector<16x16xf32>
    %44 = tpu.matmul %42, %43, %cst_17 {dimension_numbers = #tpu.dot_dimension_numbers<[1], [1], [0], [0], [0, 0, 1, 0], [], []>} : vector<16x8xbf16>, vector<16x8xbf16>, vector<16x16xf32> -> vector<16x16xf32>
    %cst_18 = arith.constant dense<0xFF800000> : vector<16xf32>
    %45 = vector.multi_reduction <maximumf>, %44, %cst_18 [1] : vector<16x16xf32> to vector<16xf32>
    %46 = vector.shape_cast %45 : vector<16xf32> to vector<16x1xf32>
    %47 = vector.broadcast %46 : vector<16x1xf32> to vector<16x16xf32>
    %48 = arith.subf %44, %47 : vector<16x16xf32>
    %49 = math.exp %48 : vector<16x16xf32>
    %cst_19 = arith.constant dense<0.000000e+00> : vector<16xf32>
    %50 = vector.multi_reduction <add>, %49, %cst_19 [1] : vector<16x16xf32> to vector<16xf32>
    %51 = vector.shape_cast %50 : vector<16xf32> to vector<16x1xf32>
    %52 = tpu.reciprocal %51 {approx = true} : vector<16x1xf32> -> vector<16x1xf32>
    %53 = vector.broadcast %52 : vector<16x1xf32> to vector<16x16xf32>
    %54 = arith.mulf %49, %53 : vector<16x16xf32>
    %55 = arith.truncf %54 : vector<16x16xf32> to vector<16x16xbf16>
    %56 = vector.extract_strided_slice %9 {offsets = [0, 16], sizes = [16, 8], strides = [1, 1]} : vector<16x32xbf16> to vector<16x8xbf16>
    %cst_20 = arith.constant dense<0.000000e+00> : vector<16x8xf32>
    %57 = tpu.matmul %55, %56, %cst_20 {dimension_numbers = #tpu.dot_dimension_numbers<[1], [0], [0], [1], [0, 0, 1, 1], [], []>} : vector<16x16xbf16>, vector<16x8xbf16>, vector<16x8xf32> -> vector<16x8xf32>
    %58 = vector.extract_strided_slice %7 {offsets = [0, 24], sizes = [16, 8], strides = [1, 1]} : vector<16x32xbf16> to vector<16x8xbf16>
    %59 = vector.extract_strided_slice %8 {offsets = [0, 24], sizes = [16, 8], strides = [1, 1]} : vector<16x32xbf16> to vector<16x8xbf16>
    %cst_21 = arith.constant dense<0.000000e+00> : vector<16x16xf32>
    %60 = tpu.matmul %58, %59, %cst_21 {dimension_numbers = #tpu.dot_dimension_numbers<[1], [1], [0], [0], [0, 0, 1, 0], [], []>} : vector<16x8xbf16>, vector<16x8xbf16>, vector<16x16xf32> -> vector<16x16xf32>
    %cst_22 = arith.constant dense<0xFF800000> : vector<16xf32>
    %61 = vector.multi_reduction <maximumf>, %60, %cst_22 [1] : vector<16x16xf32> to vector<16xf32>
    %62 = vector.shape_cast %61 : vector<16xf32> to vector<16x1xf32>
    %63 = vector.broadcast %62 : vector<16x1xf32> to vector<16x16xf32>
    %64 = arith.subf %60, %63 : vector<16x16xf32>
    %65 = math.exp %64 : vector<16x16xf32>
    %cst_23 = arith.constant dense<0.000000e+00> : vector<16xf32>
    %66 = vector.multi_reduction <add>, %65, %cst_23 [1] : vector<16x16xf32> to vector<16xf32>
    %67 = vector.shape_cast %66 : vector<16xf32> to vector<16x1xf32>
    %68 = tpu.reciprocal %67 {approx = true} : vector<16x1xf32> -> vector<16x1xf32>
    %69 = vector.broadcast %68 : vector<16x1xf32> to vector<16x16xf32>
    %70 = arith.mulf %65, %69 : vector<16x16xf32>
    %71 = arith.truncf %70 : vector<16x16xf32> to vector<16x16xbf16>
    %72 = vector.extract_strided_slice %9 {offsets = [0, 24], sizes = [16, 8], strides = [1, 1]} : vector<16x32xbf16> to vector<16x8xbf16>
    %cst_24 = arith.constant dense<0.000000e+00> : vector<16x8xf32>
    %73 = tpu.matmul %71, %72, %cst_24 {dimension_numbers = #tpu.dot_dimension_numbers<[1], [0], [0], [1], [0, 0, 1, 1], [], []>} : vector<16x16xbf16>, vector<16x8xbf16>, vector<16x8xf32> -> vector<16x8xf32>
    %74 = tpu.concatenate %25, %41, %57, %73 in 1 : vector<16x8xf32>, vector<16x8xf32>, vector<16x8xf32>, vector<16x8xf32> -> vector<16x32xf32>
    %75 = arith.truncf %74 : vector<16x32xf32> to vector<16x32xbf16>
    %c0_25 = arith.constant 0 : index
    %c0_26 = arith.constant 0 : index
    %76 = vector.load %arg6[%c0_25, %c0_26] : memref<32x64xbf16, #tpu.memory_space<vmem>>, vector<32x64xbf16>
    %cst_27 = arith.constant dense<0.000000e+00> : vector<16x64xf32>
    %77 = tpu.matmul %75, %76, %cst_27 {dimension_numbers = #tpu.dot_dimension_numbers<[1], [0], [0], [1], [0, 0, 1, 1], [], []>} : vector<16x32xbf16>, vector<32x64xbf16>, vector<16x64xf32> -> vector<16x64xf32>
    %c0_28 = arith.constant 0 : index
    %c0_29 = arith.constant 0 : index
    %78 = vector.load %arg7[%c0_28, %c0_29] : memref<1x64xf32, #tpu.memory_space<vmem>>, vector<1x64xf32>
    %79 = vector.broadcast %78 : vector<1x64xf32> to vector<16x64xf32>
    %80 = arith.addf %77, %79 : vector<16x64xf32>
    %c0_30 = arith.constant 0 : index
    %c0_31 = arith.constant 0 : index
    %81 = vector.load %arg8[%c0_30, %c0_31] : memref<16x64xf32, #tpu.memory_space<vmem>>, vector<16x64xf32>
    tpu.vector_store %arg8[%c0_30, %c0_31], %80 {strides = array<i32>} : memref<16x64xf32, #tpu.memory_space<vmem>>, vector<16x64xf32>,
    return
  }
  func.func @transform_0(%arg0: i32) -> (i32, i32) {
    %c0_i32 = arith.constant 0 : i32
    %c0_i32_0 = arith.constant 0 : i32
    return %arg0, %c0_i32 : i32, i32
  }
  func.func @transform_1(%arg0: i32) -> (i32, i32) {
    %c0_i32 = arith.constant 0 : i32
    %c0_i32_0 = arith.constant 0 : i32
    %c0_i32_1 = arith.constant 0 : i32
    return %c0_i32, %c0_i32_0 : i32, i32
  }
  func.func @transform_2(%arg0: i32) -> (i32, i32) {
    %c0_i32 = arith.constant 0 : i32
    %c0_i32_0 = arith.constant 0 : i32
    %c0_i32_1 = arith.constant 0 : i32
    return %c0_i32, %c0_i32_0 : i32, i32
  }
  func.func @transform_3(%arg0: i32) -> (i32, i32) {
    %c0_i32 = arith.constant 0 : i32
    %c0_i32_0 = arith.constant 0 : i32
    %c0_i32_1 = arith.constant 0 : i32
    return %c0_i32, %c0_i32_0 : i32, i32
  }
  func.func @transform_4(%arg0: i32) -> (i32, i32) {
    %c0_i32 = arith.constant 0 : i32
    %c0_i32_0 = arith.constant 0 : i32
    %c0_i32_1 = arith.constant 0 : i32
    return %c0_i32, %c0_i32_0 : i32, i32
  }
  func.func @transform_5(%arg0: i32) -> (i32, i32) {
    %c0_i32 = arith.constant 0 : i32
    %c0_i32_0 = arith.constant 0 : i32
    %c0_i32_1 = arith.constant 0 : i32
    return %c0_i32, %c0_i32_0 : i32, i32
  }
  func.func @transform_6(%arg0: i32) -> (i32, i32) {
    %c0_i32 = arith.constant 0 : i32
    %c0_i32_0 = arith.constant 0 : i32
    %c0_i32_1 = arith.constant 0 : i32
    return %c0_i32, %c0_i32_0 : i32, i32
  }
  func.func @transform_7(%arg0: i32) -> (i32, i32) {
    %c0_i32 = arith.constant 0 : i32
    %c0_i32_0 = arith.constant 0 : i32
    return %arg0, %c0_i32 : i32, i32
  }
}

</mosaic_0001>

<bundles_post_ra>
// kernel: reprogramming_layer_forward.3
= control target key start
LH: loop header
LB: loop body
LE: loop exit
PB: predicated region body
PF: predicated region fallthrough
CT: control target
= control target key end

     0   :  { %v150_v0 = vmov 0.0   ;;  %vm151_vm0 = vmmov 0   ;;  %vm57_vm1 = vcmask 523264   ;;  %vm110_vm2 = vcmask 257024   ;;  %s199_s1 = inlined_call_operand.vmem [shape: bf16[64,32], index: 1, kind: input, shape index: {}]   ;;  %s200_s0 = inlined_call_operand.vmem [shape: f32[16,64], index: 0, kind: input, shape index: {}]   ;;  %s201_s2 = inlined_call_operand.vmem [shape: f32[1,32], index: 2, kind: input, shape index: {}]   ;;  %s202_s3 = inlined_call_operand.vmem [shape: bf16[16,32], index: 3, kind: output, shape index: {}]  }
   0x1   :  { %132 = vmatprep.subr.bf16.mxu0 %v150_v0  ;;  %v146_v1 = vld [vmem:[%s199_s1] sm:$0xff]   ;;  %140 = vmatprep.mubr.msk.bf16.mxu0 %vm151_vm0, %v150_v0  ;;  %v147_v2 = vld [vmem:[%s199_s1 + $0x8] sm:$0xff]   ;;  %v148_v3 = vld [vmem:[%s199_s1 + $0x10] sm:$0xff]  }
   0x2   :  { %133 = vmatpush3.bf16.msra.mxu0 %v146_v1  ;;  %v149_v4 = vld [vmem:[%s199_s1 + $0x18] sm:$0xff]   ;;  %v15_v5 = vld [vmem:[%s200_s0] sm:$0xff]  ;;  %v16_v6 = vld [vmem:[%s200_s0 + $0x8] sm:$0xff] }
   0x3   :  { %134 = vmatprep.subr.bf16.mxu0 %v150_v0  ;;  %v17_v7 = vpack.c.bf16 %v16_v6, %v15_v5  ;;  %v117_v8 = vld [vmem:[%s201_s2] ss:$0 sm:$0xff] }
   0x6   :  { %135 = vmatpush3.bf16.msra.mxu0 %v147_v2 }
   0x7   :  { %136 = vmatprep.subr.bf16.mxu0 %v150_v0 }
   0xa   :  { %137 = vmatpush3.bf16.msra.mxu0 %v148_v3 }
   0xb   :  { %138 = vmatprep.subr.bf16.mxu0 %v150_v0 }
   0xe   :  { %139 = vmatpush3.bf16.msra.mxu0 %v149_v4 }
  0x11   :  { %141 = vmatmul.mubr.msk.bf16.vlgmr.msra.gmra.mrb[0].mxu0 %vm57_vm1, %v17_v7 }
  0xe4   :  { %v95_v9 = vpop.f32.mrb[0].mxu0 }
  0xe5   :  { %v96_v10 = vadd.f32 %v117_v8, %v95_v9  ;;  %v142_v11 = vpop.f32.mrb[1].mxu0 }
  0xe6   :  { %v98_v12 = vpop.f32.mrb[2].mxu0 }
  0xe7   :  { %v125_v13 = vpack.c.bf16 %v96_v10, %v96_v10  ;;  %v99_v14 = vadd.f32 %v117_v8, %v98_v12  ;;  %v143_v15 = vpop.f32.mrb[3].mxu0 }
  0xe9   :  { %111 = vst.msk [vmem:[%s202_s3] sm:$0xf] %vm110_vm2, %v125_v13  ;;  %v126_v16 = vpack.c.bf16 %v99_v14, %v99_v14 }
  0xeb   :  { %112 = vst.msk [vmem:[%s202_s3 + $0x4] sm:$0xf] %vm110_vm2, %v126_v16 }

// kernel: reprogramming_layer_forward.5
= control target key start
LH: loop header
LB: loop body
LE: loop exit
PB: predicated region body
PF: predicated region fallthrough
CT: control target
= control target key end

     0   :  { %v904_v1 = vmov 0.0   ;;  %vm905_vm0 = vmmov 0   ;;  %vm54_vm1 = vcmask 261120   ;;  %s1079_s0 = inlined_call_operand.vmem [shape: f32[16,32], index: 0, kind: input, shape index: {}]   ;;  %s1080_s1 = inlined_call_operand.vmem [shape: bf16[32,32], index: 1, kind: input, shape index: {}]   ;;  %s1081_s2 = inlined_call_operand.vmem [shape: f32[1,32], index: 2, kind: input, shape index: {}]   ;;  %s1082_s3 = inlined_call_operand.vmem [shape: bf16[16,32], index: 3, kind: input, shape index: {}]   ;;  %s1083_s4 = inlined_call_operand.vmem [shape: bf16[16,32], index: 4, kind: input, shape index: {}]   ;;  %s1084_s5 = inlined_call_operand.vmem [shape: bf16[32,64], index: 5, kind: input, shape index: {}]   ;;  %s1085_s6 = inlined_call_operand.vmem [shape: f32[1,64], index: 6, kind: input, shape index: {}]   ;;  %s1086_s7 = inlined_call_operand.hbm [shape: f32[16,64], index: 7, kind: output, shape index: {}]  }
   0x1   :  { %v842_v0 = vld [vmem:[%s1080_s1] sm:$0xff]   ;;  %753 = vmatprep.subr.bf16.mxu0 %v904_v1  ;;  %v843_v2 = vld [vmem:[%s1080_s1 + $0x8] sm:$0xff]   ;;  %761 = vmatprep.subr.bf16.mxu1 %v904_v1  ;;  %s906_s1 = smov 120  }
   0x2   :  { %754 = vmatpush3.bf16.msra.mxu0 %v842_v0  ;;  %757 = vmatprep.mubr.msk.bf16.mxu0 %vm905_vm0, %v904_v1  ;;  %v28_v3 = vld [vmem:[%s1079_s0] sm:$0xff]  ;;  %v29_v4 = vld [vmem:[%s1079_s0 + $0x8] sm:$0xff] }
   0x3   :  { %755 = vmatprep.subr.bf16.mxu0 %v904_v1  ;;  %v844_v5 = vld [vmem:[%s1082_s3] sm:$0xff]   ;;  %763 = vmatprep.mubr.msk.bf16.mxu1 %vm905_vm0, %v904_v1  ;;  %v30_v6 = vpack.c.bf16 %v29_v4, %v28_v3 }
   0x4   :  { %234 = vrot.lane.b32.xlu0 %v844_v5, %s906_s1 }
   0x6   :  { %756 = vmatpush3.bf16.msra.mxu0 %v843_v2 }
   0x7   :  { %12 = vsyncpa [#allocation3], 0  ;;  %767 = vmatprep.subr.bf16.mxu0 %v904_v1  ;;  %vm109_vm2 = vcmask 64512   ;;  %s907_s0 = smov 112   ;;  %v713_v8 = vld [vmem:[%s1081_s2] ss:$0 sm:$0xff] }
   0x8   :  { %v114_v7 = vsel %vm109_vm2, %v844_v5, 0  ;;  %355 = vrot.lane.b32.xlu1 %v844_v5, %s907_s0  ;;  %s908_s2 = smov 104   ;;  %vm157_vm3 = vcmask 130048   ;;  %v1014_v31 = vld [vmem:[%s1083_s4] sm:$0xff]   ;;  %s909_s15 = smov 8   ;;  %vm623_vm4 = vcmask 195584  }
   0x9   :  { %758 = vmatmul.mubr.msk.bf16.vlgmr.msra.gmra.mrb[0].mxu0 %vm54_vm1, %v30_v6  ;;  %762 = vmatpush3.bf16.xpose.msra.mxu1 %v114_v7  ;;  %s910_s18 = smov 16   ;;  %s911_s19 = smov 24   ;;  %vm694_vm5 = vcmask 523264  }
   0xa   :  { %769 = vmatprep.mubr.msk.bf16.mxu0 %vm905_vm0, %v904_v1  ;;  %773 = vmatprep.subr.bf16.mxu1 %v904_v1  ;;  %s912_s21 = smov [#allocation2]  }
   0xb   :  { %768 = vmatpush3.bf16.msra.mxu0 %v1014_v31  ;;  %s702_s22 = sshll.u32 %s912_s21, 4  ;;  %s703_s22 = int_to_ptr.vmem [resolvable:$true] %s702_s22 }
   0xc   :  { %779 = vmatprep.subr.bf16.mxu0 %v904_v1  ;;  %s880_s23 = scalar_lea.vmem %s703_s22, 256  ;;  %p885_p1 = scmp.lt.s32.totalorder %s703_s22, %s703_s22 }
   0xd   :  { %p881_p0 = scmp.ne.s32.totalorder %s703_s22, %s880_s23  ;;  %p886_p2 = scmp.lt.s32.totalorder %s880_s23, %s880_s23 }
   0xf   :  { %p887_p3 = por %p886_p2, %p885_p1 }
  0x11   :  { %p888_p4 = pnand %p887_p3, %p881_p0 }
  0x76   :  { %v235_v15 = vpop.permute.xlu0 %234 }
  0x77   :  { %v240_v17 = vsel %vm109_vm2, %v235_v15, 0 }
  0x7a   :  { %v356_v18 = vpop.permute.xlu1 %355 }
  0x7b   :  { %v361_v19 = vsel %vm109_vm2, %v356_v18, 0 }
  0xdc   :  { %v92_v9 = vpop.f32.mrb[0].mxu0 }
  0xdd   :  { %v759_v10 = vpop.f32.mrb[1].mxu0  ;;  %v93_v12 = vadd.f32 %v713_v8, %v92_v9 }
  0xde   :  { %v95_v11 = vpop.f32.mrb[2].mxu0 }
  0xdf   :  { %v96_v13 = vadd.f32 %v713_v8, %v95_v11  ;;  %v760_v14 = vpop.f32.mrb[3].mxu0 }
  0xe1   :  { %v99_v16 = vpack.c.bf16 %v96_v13, %v93_v12 }
  0xe3   :  { %353 = vrot.lane.b32.xlu1 %v99_v16, %s907_s0  ;;  %232 = vrot.lane.b32.xlu0 %v99_v16, %s906_s1 }
  0xe4   :  { %764 = vmatmul.mubr.msk.bf16.vlgmr.msra.gmra.mrb[0].mxu1 %vm109_vm2, %v99_v16 }
  0xe5   :  { %774 = vmatpush3.bf16.xpose.msra.mxu1 %v240_v17  ;;  %775 = vmatprep.mubr.msk.bf16.mxu1 %vm905_vm0, %v904_v1 }
  0xe6   :  { %785 = vmatprep.subr.bf16.mxu1 %v904_v1 }
  0xe7   :  { %474 = vrot.lane.b32.xlu1 %v99_v16, %s908_s2  ;;  %476 = vrot.lane.b32.xlu0 %v844_v5, %s908_s2 }
 0x155   :  { %v233_v20 = vpop.permute.xlu0 %232  ;;  %v354_v23 = vpop.permute.xlu1 %353 }
 0x156   :  { %776 = vmatmul.mubr.msk.bf16.vlgmr.msra.gmra.mrb[4].mxu1 %vm109_vm2, %v233_v20 }
 0x157   :  { %786 = vmatpush3.bf16.xpose.msra.mxu1 %v361_v19  ;;  %787 = vmatprep.mubr.msk.bf16.mxu1 %vm905_vm0, %v904_v1 }
 0x158   :  { %797 = vmatprep.subr.bf16.mxu1 %v904_v1 }
 0x159   :  { %v477_v21 = vpop.permute.xlu0 %476  ;;  %v475_v24 = vpop.permute.xlu1 %474 }
 0x15a   :  { %v482_v22 = vsel %vm109_vm2, %v477_v21, 0 }
 0x15e   :  { %788 = vmatmul.mubr.msk.bf16.vlgmr.msra.gmra.mrb[8].mxu1 %vm109_vm2, %v354_v23 }
 0x15f   :  { %798 = vmatpush3.bf16.xpose.msra.mxu1 %v482_v22  ;;  %799 = vmatprep.mubr.msk.bf16.mxu1 %vm905_vm0, %v904_v1 }
 0x160   :  { %809 = vmatprep.subr.bf16.mxu1 %v904_v1 }
 0x166   :  { %800 = vmatmul.mubr.msk.bf16.vlgmr.msra.gmra.mrb[12].mxu1 %vm109_vm2, %v475_v24 }
 0x167   :  { %813 = vmatprep.mubr.msk.bf16.mxu1 %vm905_vm0, %v904_v1 }
 0x1b7   :  { %v150_v25 = vpop.f32.mrb[0].mxu1 }
 0x1b8   :  { %v765_v26 = vpop.f32.mrb[1].mxu1  ;;  %v158_v27 = vsel %vm157_vm3, %v150_v25, -inf }
 0x1b9   :  { %159 = vmax.xlane.f32.xlu0 %v158_v27  ;;  %v153_v28 = vpop.f32.mrb[2].mxu1 }
 0x1ba   :  { %v766_v29 = vpop.f32.mrb[3].mxu1  ;;  %v161_v30 = vsel %vm157_vm3, %v153_v28, -inf }
 0x1bb   :  { %162 = vmax.xlane.f32.xlu1 %v161_v30 }
 0x229   :  { %v276_v32 = vpop.f32.mrb[4].mxu1 }
 0x22a   :  { %v777_v33 = vpop.f32.mrb[5].mxu1  ;;  %v283_v34 = vsel %vm157_vm3, %v276_v32, -inf }
 0x22b   :  { %284 = vmax.xlane.f32.xlu0 %v283_v34  ;;  %v279_v35 = vpop.f32.mrb[6].mxu1 }
 0x22c   :  { %v778_v36 = vpop.f32.mrb[7].mxu1  ;;  %v286_v37 = vsel %vm157_vm3, %v279_v35, -inf }
 0x22f   :  { %287 = vmax.xlane.f32.xlu0 %v286_v37 }
 0x231   :  { %v397_v38 = vpop.f32.mrb[8].mxu1 }
 0x232   :  { %v789_v39 = vpop.f32.mrb[9].mxu1  ;;  %v404_v40 = vsel %vm157_vm3, %v397_v38, -inf }
 0x233   :  { %405 = vmax.xlane.f32.xlu1 %v404_v40  ;;  %v400_v41 = vpop.f32.mrb[10].mxu1 }
 0x234   :  { %v790_v42 = vpop.f32.mrb[11].mxu1  ;;  %v407_v43 = vsel %vm157_vm3, %v400_v41, -inf }
 0x235   :  { %408 = vmax.xlane.f32.xlu0 %v407_v43 }
 0x239   :  { %v518_v44 = vpop.f32.mrb[12].mxu1 }
 0x23a   :  { %v801_v45 = vpop.f32.mrb[13].mxu1  ;;  %v525_v46 = vsel %vm157_vm3, %v518_v44, -inf }
 0x23b   :  { %526 = vmax.xlane.f32.xlu1 %v525_v46  ;;  %v521_v47 = vpop.f32.mrb[14].mxu1 }
 0x23c   :  { %v802_v48 = vpop.f32.mrb[15].mxu1  ;;  %v528_v49 = vsel %vm157_vm3, %v521_v47, -inf }
 0x23d   :  { %529 = vmax.xlane.f32.xlu0 %v528_v49 }
 0x246   :  { %v160_v50 = vpop.xlane.xlu0 %159 }
 0x247   :  { %v164_v51 = vsub.f32 %v150_v25, %v160_v50 }
 0x248   :  { %v163_v52 = vpop.xlane.xlu1 %162 }
 0x249   :  { %v166_v53 = vmul.f32 1.442695, %v164_v51  ;;  %v165_v54 = vsub.f32 %v153_v28, %v163_v52 }
 0x24b   :  { %848 = vpow2.f32 %v166_v53  ;;  %v168_v55 = vmul.f32 1.442695, %v165_v54 }
 0x24d   :  { %850 = vpow2.f32 %v168_v55 }
 0x255   :  { %v849_v56 = vpop.eup %848 }
 0x256   :  { %v170_v57 = vsel %vm157_vm3, %v849_v56, 0.0 }
 0x257   :  { %v851_v58 = vpop.eup %850  ;;  %171 = vadd.xlane.f32.xlu1 %v170_v57 }
 0x258   :  { %v173_v59 = vsel %vm157_vm3, %v851_v58, 0.0 }
 0x259   :  { %174 = vadd.xlane.f32.xlu0 %v173_v59 }
 0x268   :  { %306 = vrot.lane.b32.xlu1 %v1014_v31, %s906_s1 }
 0x2b8   :  { %v285_v60 = vpop.xlane.xlu0 %284 }
 0x2b9   :  { %v289_v61 = vsub.f32 %v276_v32, %v285_v60 }
 0x2bb   :  { %v291_v62 = vmul.f32 1.442695, %v289_v61 }
 0x2bc   :  { %v288_v63 = vpop.xlane.xlu0 %287 }
 0x2bd   :  { %852 = vpow2.f32 %v291_v62  ;;  %v290_v0 = vsub.f32 %v279_v35, %v288_v63 }
 0x2bf   :  { %v293_v2 = vmul.f32 1.442695, %v290_v0 }
 0x2c0   :  { %v406_v3 = vpop.xlane.xlu1 %405 }
 0x2c1   :  { %854 = vpow2.f32 %v293_v2  ;;  %v410_v4 = vsub.f32 %v397_v38, %v406_v3  ;;  %v846_v2 = vld [vmem:[%s1084_s5] sm:$0xff]  }
 0x2c2   :  { %v409_v5 = vpop.xlane.xlu0 %408  ;;  %810 = vmatpush3.bf16.msra.mxu1 %v846_v2 }
 0x2c3   :  { %v412_v6 = vmul.f32 1.442695, %v410_v4  ;;  %v411_v7 = vsub.f32 %v400_v41, %v409_v5  ;;  %811 = vmatprep.subr.bf16.mxu1 %v904_v1 }
 0x2c5   :  { %856 = vpow2.f32 %v412_v6  ;;  %v414_v8 = vmul.f32 1.442695, %v411_v7  ;;  %v847_v7 = vld [vmem:[%s1084_s5 + $0x8] sm:$0xff]  }
 0x2c6   :  { %812 = vmatpush3.bf16.msra.mxu1 %v847_v7 }
 0x2c7   :  { %v853_v9 = vpop.eup %852  ;;  %858 = vpow2.f32 %v414_v8 }
 0x2c8   :  { %v527_v10 = vpop.xlane.xlu1 %526  ;;  %v295_v11 = vsel %vm157_vm3, %v853_v9, 0.0 }
 0x2c9   :  { %v531_v12 = vsub.f32 %v518_v44, %v527_v10  ;;  %296 = vadd.xlane.f32.xlu1 %v295_v11 }
 0x2ca   :  { %v530_v13 = vpop.xlane.xlu0 %529 }
 0x2cb   :  { %v855_v14 = vpop.eup %854  ;;  %v533_v15 = vmul.f32 1.442695, %v531_v12  ;;  %v532_v16 = vsub.f32 %v521_v47, %v530_v13 }
 0x2cc   :  { %v298_v17 = vsel %vm157_vm3, %v855_v14, 0.0 }
 0x2cd   :  { %860 = vpow2.f32 %v533_v15  ;;  %v535_v18 = vmul.f32 1.442695, %v532_v16  ;;  %299 = vadd.xlane.f32.xlu0 %v298_v17 }
 0x2cf   :  { %v857_v19 = vpop.eup %856  ;;  %862 = vpow2.f32 %v535_v18 }
 0x2d0   :  { %v416_v20 = vsel %vm157_vm3, %v857_v19, 0.0 }
 0x2d1   :  { %v859_v21 = vpop.eup %858  ;;  %417 = vadd.xlane.f32.xlu1 %v416_v20 }
 0x2d2   :  { %v419_v22 = vsel %vm157_vm3, %v859_v21, 0.0 }
 0x2d3   :  { %420 = vadd.xlane.f32.xlu0 %v419_v22 }
 0x2d7   :  { %v861_v23 = vpop.eup %860 }
 0x2d8   :  { %v537_v24 = vsel %vm157_vm3, %v861_v23, 0.0 }
 0x2d9   :  { %v863_v25 = vpop.eup %862  ;;  %538 = vadd.xlane.f32.xlu1 %v537_v24 }
 0x2da   :  { %v540_v26 = vsel %vm157_vm3, %v863_v25, 0.0 }
 0x2db   :  { %541 = vadd.xlane.f32.xlu0 %v540_v26 }
 0x2e4   :  { %v172_v27 = vpop.xlane.xlu1 %171 }
 0x2e5   :  { %864 = vrcp.f32 %v172_v27 }
 0x2e6   :  { %v175_v28 = vpop.xlane.xlu0 %174 }
 0x2e7   :  { %866 = vrcp.f32 %v175_v28 }
 0x2e8   :  { %v307_v35 = vpop.permute.xlu1 %306 }
 0x2ea   :  { %548 = vrot.lane.b32.xlu1 %v1014_v31, %s908_s2 }
 0x2ef   :  { %v865_v29 = vpop.eup %864 }
 0x2f0   :  { %v178_v32 = vmul.f32 %v865_v29, %v849_v56 }
 0x2f1   :  { %v867_v30 = vpop.eup %866  ;;  %427 = vrot.lane.b32.xlu0 %v1014_v31, %s907_s0 }
 0x2f2   :  { %v179_v33 = vmul.f32 %v867_v30, %v851_v58 }
 0x2f4   :  { %v180_v34 = vpack.c.bf16 %v179_v33, %v178_v32  ;;  %v727_v32 = vld [vmem:[%s1085_s6] ss:$0 sm:$0xff] }
 0x2f6   :  { %770 = vmatmul.mubr.msk.bf16.vlgmr.msra.gmra.mrb[4].mxu0 %vm157_vm3, %v180_v34 }
 0x2f7   :  { %780 = vmatpush3.bf16.msra.mxu0 %v307_v35  ;;  %781 = vmatprep.mubr.msk.bf16.mxu0 %vm905_vm0, %v904_v1 }
 0x2f8   :  { %791 = vmatprep.subr.bf16.mxu0 %v904_v1 }
 0x356   :  { %v297_v36 = vpop.xlane.xlu1 %296 }
 0x357   :  { %868 = vrcp.f32 %v297_v36 }
 0x35a   :  { %v300_v37 = vpop.xlane.xlu0 %299 }
 0x35b   :  { %870 = vrcp.f32 %v300_v37 }
 0x35e   :  { %v418_v38 = vpop.xlane.xlu1 %417 }
 0x35f   :  { %872 = vrcp.f32 %v418_v38 }
 0x360   :  { %v421_v39 = vpop.xlane.xlu0 %420 }
 0x361   :  { %874 = vrcp.f32 %v421_v39  ;;  %v869_v31 = vpop.eup %868 }
 0x362   :  { %v303_v41 = vmul.f32 %v869_v31, %v853_v9 }
 0x365   :  { %v871_v40 = vpop.eup %870 }
 0x366   :  { %v304_v42 = vmul.f32 %v871_v40, %v855_v14  ;;  %v539_v43 = vpop.xlane.xlu1 %538 }
 0x367   :  { %876 = vrcp.f32 %v539_v43 }
 0x368   :  { %v542_v44 = vpop.xlane.xlu0 %541  ;;  %v305_v45 = vpack.c.bf16 %v304_v42, %v303_v41 }
 0x369   :  { %878 = vrcp.f32 %v542_v44  ;;  %v873_v46 = vpop.eup %872 }
 0x36a   :  { %782 = vmatmul.mubr.msk.bf16.vlgmr.msra.gmra.mrb[8].mxu0 %vm157_vm3, %v305_v45  ;;  %v424_v50 = vmul.f32 %v873_v46, %v857_v19  ;;  %v549_v52 = vpop.permute.xlu1 %548 }
 0x36b   :  { %v875_v47 = vpop.eup %874  ;;  %793 = vmatprep.mubr.msk.bf16.mxu0 %vm905_vm0, %v904_v1 }
 0x36c   :  { %v425_v48 = vmul.f32 %v875_v47, %v859_v21  ;;  %v428_v49 = vpop.permute.xlu0 %427 }
 0x36d   :  { %792 = vmatpush3.bf16.msra.mxu0 %v428_v49 }
 0x36e   :  { %803 = vmatprep.subr.bf16.mxu0 %v904_v1  ;;  %v426_v51 = vpack.c.bf16 %v425_v48, %v424_v50 }
 0x371   :  { %v877_v53 = vpop.eup %876 }
 0x372   :  { %794 = vmatmul.mubr.msk.bf16.vlgmr.msra.gmra.mrb[12].mxu0 %vm157_vm3, %v426_v51  ;;  %v545_v56 = vmul.f32 %v877_v53, %v861_v23 }
 0x373   :  { %v879_v54 = vpop.eup %878  ;;  %804 = vmatpush3.bf16.msra.mxu0 %v549_v52  ;;  %805 = vmatprep.mubr.msk.bf16.mxu0 %vm905_vm0, %v904_v1 }
 0x374   :  { %v546_v55 = vmul.f32 %v879_v54, %v863_v25 }
 0x376   :  { %v547_v57 = vpack.c.bf16 %v546_v55, %v545_v56 }
 0x37a   :  { %806 = vmatmul.mubr.msk.bf16.vlgmr.msra.gmra.mrb[16].mxu0 %vm157_vm3, %v547_v57 }
 0x3c9   :  { %v224_v58 = vpop.f32.mrb[4].mxu0 }
 0x3ca   :  { %v771_v59 = vpop.f32.mrb[5].mxu0 }
 0x3cb   :  { %v227_v60 = vpop.f32.mrb[6].mxu0 }
 0x3cc   :  { %v772_v61 = vpop.f32.mrb[7].mxu0 }
 0x43d   :  { %v346_v62 = vpop.f32.mrb[8].mxu0 }
 0x43e   :  { %v783_v63 = vpop.f32.mrb[9].mxu0 }
 0x43f   :  { %v349_v0 = vpop.f32.mrb[10].mxu0 }
 0x440   :  { %v827_v3 = vpack.i.bf16 %v349_v0, %v346_v62  ;;  %v784_v4 = vpop.f32.mrb[11].mxu0 }
 0x442   :  { %828 = vrot.lane.b32.xlu1 %v827_v3, %s909_s15 }
 0x445   :  { %v467_v5 = vpop.f32.mrb[12].mxu0 }
 0x446   :  { %v795_v6 = vpop.f32.mrb[13].mxu0 }
 0x447   :  { %v470_v8 = vpop.f32.mrb[14].mxu0 }
 0x448   :  { %v832_v9 = vpack.i.bf16 %v470_v8, %v467_v5  ;;  %v796_v10 = vpop.f32.mrb[15].mxu0 }
 0x44a   :  { %833 = vrot.lane.b32.xlu0 %v832_v9, %s910_s18 }
 0x44d   :  { %v588_v11 = vpop.f32.mrb[16].mxu0 }
 0x44e   :  { %v807_v12 = vpop.f32.mrb[17].mxu0 }
 0x44f   :  { %v591_v13 = vpop.f32.mrb[18].mxu0 }
 0x450   :  { %v837_v14 = vpack.i.bf16 %v591_v13, %v588_v11  ;;  %v808_v15 = vpop.f32.mrb[19].mxu0 }
 0x452   :  { %838 = vrot.lane.b32.xlu1 %v837_v14, %s911_s19 }
 0x4b4   :  { %v829_v1 = vpop.permute.xlu1 %828 }
 0x4b5   :  { %v831_v17 = vunpack.i.h.bf16 %v829_v1  ;;  %v830_v18 = vunpack.i.l.bf16 %v829_v1 }
 0x4b7   :  { %v620_v22 = vsel %vm109_vm2, %v227_v60, %v831_v17  ;;  %v619_v23 = vsel %vm109_vm2, %v224_v58, %v830_v18 }
 0x4bc   :  { %v834_v16 = vpop.permute.xlu0 %833 }
 0x4bd   :  { %v836_v19 = vunpack.i.h.bf16 %v834_v16  ;;  %v835_v20 = vunpack.i.l.bf16 %v834_v16 }
 0x4bf   :  { %v622_v26 = vsel %vm157_vm3, %v620_v22, %v836_v19  ;;  %v621_v27 = vsel %vm157_vm3, %v619_v23, %v835_v20 }
 0x4c4   :  { %v839_v21 = vpop.permute.xlu1 %838 }
 0x4c5   :  { %v841_v24 = vunpack.i.h.bf16 %v839_v21  ;;  %v840_v25 = vunpack.i.l.bf16 %v839_v21 }
 0x4c7   :  { %v625_v28 = vsel %vm623_vm4, %v622_v26, %v841_v24  ;;  %v624_v29 = vsel %vm623_vm4, %v621_v27, %v840_v25 }
 0x4c8   :  { %v626_v30 = vpack.c.bf16 %v625_v28, %v624_v29 }
 0x4ca   :  { %814 = vmatmul.mubr.msk.bf16.vlgmr.msra.gmra.mrb[16].mxu1 %vm54_vm1, %v626_v30 }
 0x59d   :  { %v687_v33 = vpop.f32.mrb[16].mxu1 }
 0x59e   :  { %v688_v34 = vadd.f32 %v727_v32, %v687_v33  ;;  %v815_v35 = vpop.f32.mrb[17].mxu1 }
 0x59f   :  { %v690_v36 = vpop.f32.mrb[18].mxu1 }
 0x5a0   :  { %695 = vst.msk [vmem:[#allocation2] sm:$0xff] %vm694_vm5, %v688_v34  ;;  %v691_v37 = vadd.f32 %v727_v32, %v690_v36  ;;  %v816_v38 = vpop.f32.mrb[19].mxu1 }
 0x5a2   :  { %696 = vst.msk [vmem:[#allocation2 + $0x8] sm:$0xff] %vm694_vm5, %v691_v37 }
 0x5a3   :  { %891 = shalt.err (!%p888_p4)
}
 0x5a4   :  { %s892_s25 = scalar_lea.hbm %s1086_s7, 256 }
 0x5a5   :  { %p893_p5 = scmp.ne.s32.totalorder %s1086_s7, %s892_s25  ;;  %p896_p6 = scmp.lt.u32.totalorder %s892_s25, %s1086_s7 }
 0x5a7   :  { %p898_p7 = pnand %p896_p6, %p893_p5 }
 0x5a9   :  { %901 = shalt.err (!%p898_p7)
}
 0x5aa   :  { %s913_s30 = smov 128  }
 0x5ab   :  { %708 = dma.vmem_to_hbm [thread:$0]  %s703_s22, 256, %s1086_s7, [#allocation3], %s913_s30, %s913_s30, %s909_s15  }
 0x5ac   :  { %902 = dma.done.wait [#allocation3], 256  }
 0x5ad   :  { %903 = vsyncadd [#allocation3], 4294967040 }
 0x5ae   :  { %712 = vsyncpa [#allocation3], 1 }

</bundles_post_ra>
